<compile_context>
chip_gen: v7x
topology: tpu7x:2x2x1
jax: 0.10.0
libtpu: 0.0.40
codegen_flags: <defaults>
</compile_context>

<pallas_src>
import math

import jax
import jax.numpy as jnp
from jax.experimental import pallas as pl
from jax.experimental.pallas import tpu as pltpu


def _round_up(x, m):
    return ((x + m - 1) // m) * m


def _fused_matmul_bias_kernel(x_ref, w_ref, b_ref, out_ref):
    """One (tm, tn) f32 output tile, accumulated in place over the K grid axis."""
    k = pl.program_id(2)

    @pl.when(k == 0)
    def _():
        # Initialize the resident output block with the (broadcast) bias.
        out_ref[...] = jnp.broadcast_to(b_ref[...], out_ref.shape)

    out_ref[...] += jnp.dot(
        x_ref[...], w_ref[...], preferred_element_type=jnp.float32
    )


def fuse_complex_linear_params(w_real, b_real, w_imag, b_imag, *,
                               tn=512, tk=1024,
                               compute_dtype=jnp.bfloat16):
    """Fuse + pad + cast PyTorch-layout params ONCE, at parameter-prep time.

    w_*: (out, in), b_*: (out,).
    Produces w_cat: (Kp, Np) in compute_dtype and b_cat: (1, Np) f32, where
    Kp/Np are padded to the chosen tk/tn tile multiples, so the forward pass
    never touches the weights outside the kernel.
    """
    N, K = w_real.shape
    N2 = 2 * N

    w_cat = jnp.concatenate([w_real.T, w_imag.T], axis=1)          # (K, 2N)
    b_cat = jnp.concatenate([b_real, b_imag]).reshape(1, -1)        # (1, 2N)

    # Clamp tiles to the (padded) problem so tiny shapes still satisfy the
    # (8, 128) block constraint with a single block per axis.
    tn = min(tn, _round_up(N2, 128))
    tk = min(tk, _round_up(K, 128))
    Np = _round_up(N2, tn)
    Kp = _round_up(K, tk)

    # v7x has 2 TensorCores sharded over the parallel grid axes: if the whole
    # output width fits one tile, split it in two (still >= 256 lanes wide).
    if Np == tn and tn >= 512 and tn % 256 == 0:
        tn //= 2                      # Np == 2 * tn, still an exact multiple

    if (Kp, Np) != (K, N2):
        w_cat = jnp.pad(w_cat, ((0, Kp - K), (0, Np - N2)))
    if Np != N2:
        b_cat = jnp.pad(b_cat, ((0, 0), (0, Np - N2)))

    w_cat = w_cat.astype(compute_dtype)
    b_cat = b_cat.astype(jnp.float32)

    return dict(w_cat=w_cat, b_cat=b_cat,
                in_features=K, out_features=N,
                tn=tn, tk=tk, compute_dtype=compute_dtype)


def complex_linear(x, params, *, tm=512, return_planes=False):
    """ComplexLinear forward.

    x: (B, in) f32 (or already compute_dtype).
    Returns complex64 (B, out), or (real, imag) f32 planes if return_planes.
    """
    w_cat = params["w_cat"]
    b_cat = params["b_cat"]
    K = params["in_features"]
    N = params["out_features"]
    N2 = 2 * N
    tn = params["tn"]
    tk = params["tk"]
    compute_dtype = params["compute_dtype"]

    B, Kx = x.shape
    assert Kx == K, (Kx, K)
    Kp, Np = w_cat.shape

    if x.dtype != compute_dtype:
        x = x.astype(compute_dtype)

    # Sublane tile minimum depends on packing (16 rows for 2-byte dtypes).
    itemsize = jnp.dtype(compute_dtype).itemsize
    sub = 8 if itemsize >= 4 else (16 if itemsize == 2 else 32)
    tm = min(tm, _round_up(B, sub))
    Mp = _round_up(B, tm)

    # Only pad x when the batch / K are not already tile-aligned (zeros
    # contribute nothing; padded output rows are sliced off below).
    if (Mp, Kp) != (B, K):
        x = jnp.pad(x, ((0, Mp - B), (0, Kp - K)))

    grid = (Mp // tm, Np // tn, Kp // tk)

    flops = 2 * B * K * N2                                # both branches, fused
    bytes_accessed = (
        B * K * itemsize + Kp * Np * itemsize + Np * 4 + B * N2 * 4
    )

    out = pl.pallas_call(
        _fused_matmul_bias_kernel,
        out_shape=jax.ShapeDtypeStruct((Mp, Np), jnp.float32),
        grid_spec=pltpu.PrefetchScalarGridSpec(
            num_scalar_prefetch=0,
            grid=grid,
            in_specs=[
                pl.BlockSpec((tm, tk), lambda i, j, k: (i, k)),   # x
                # If profiling shows the K-axis DMA exposed with very large tk,
                # add pipeline_mode=pl.Buffered(3) here.
                pl.BlockSpec((tk, tn), lambda i, j, k: (k, j)),   # [W_r|W_i]
                pl.BlockSpec((1, tn), lambda i, j, k: (0, j)),    # [b_r|b_i]
            ],
            out_specs=pl.BlockSpec((tm, tn), lambda i, j, k: (i, j)),
        ),
        compiler_params=pltpu.CompilerParams(
            dimension_semantics=("parallel", "parallel", "arbitrary"),
            # Safe on v7x's 64 MiB VMEM; v6e/v5e users may raise to ~96 MiB.
            vmem_limit_bytes=48 * 1024 * 1024,
        ),
        cost_estimate=pl.CostEstimate(
            flops=flops, transcendentals=0, bytes_accessed=bytes_accessed
        ),
    )(x, w_cat, b_cat)

    out_r = out[:B, :N]
    out_i = out[:B, N:N2]
    if return_planes:
        return out_r, out_i
    # Complex combine is JAX glue (complex64 is not a VMEM-native dtype).
    return jax.lax.complex(out_r, out_i)


def init_complex_linear_params(key, in_features, out_features):
    """Deterministic init mimicking nn.Linear default (U(-1/sqrt(in), 1/sqrt(in)))."""
    k1, k2, k3, k4 = jax.random.split(key, 4)
    bound = 1.0 / math.sqrt(in_features)
    w_real = jax.random.uniform(k1, (out_features, in_features), jnp.float32,
                                -bound, bound)
    b_real = jax.random.uniform(k2, (out_features,), jnp.float32, -bound, bound)
    w_imag = jax.random.uniform(k3, (out_features, in_features), jnp.float32,
                                -bound, bound)
    b_imag = jax.random.uniform(k4, (out_features,), jnp.float32, -bound, bound)
    return w_real, b_real, w_imag, b_imag


def _reference(x, w_real, b_real, w_imag, b_imag):
    return (x @ w_real.T + b_real) + 1j * (x @ w_imag.T + b_imag)


if __name__ == "__main__":
    key = jax.random.PRNGKey(0)
    k_params, k_x, k_params2, k_x2 = jax.random.split(key, 4)

    # --- Small-shape tests (matches the module's toy usage; single-block grid) ---
    batch, in_features, out_features = 8, 32, 32
    w_real, b_real, w_imag, b_imag = init_complex_linear_params(
        k_params, in_features, out_features)
    x = jax.random.normal(k_x, (batch, in_features), jnp.float32)
    ref = _reference(x, w_real, b_real, w_imag, b_imag)

    # (a) exact fp32 compute path — tight tolerance.
    params_f32 = fuse_complex_linear_params(
        w_real, b_real, w_imag, b_imag, compute_dtype=jnp.float32)
    out_f32 = jax.block_until_ready(complex_linear(x, params_f32))
    assert out_f32.shape == (batch, out_features)
    assert out_f32.dtype == jnp.complex64
    assert jnp.allclose(out_f32, ref, atol=1e-5, rtol=1e-5)

    # (b) default bf16 compute path (f32 accumulate) — bf16-level tolerance.
    params_bf16 = fuse_complex_linear_params(w_real, b_real, w_imag, b_imag)
    out_bf16 = jax.block_until_ready(complex_linear(x, params_bf16))
    assert out_bf16.shape == (batch, out_features)
    assert out_bf16.dtype == jnp.complex64
    assert jnp.allclose(out_bf16, ref, atol=3e-2, rtol=3e-2)

    # --- Gridded tests (exercise M/N tiling and the K in-place accumulation) ---
    B2, IN2, OUT2 = 256, 1024, 256
    w_real2, b_real2, w_imag2, b_imag2 = init_complex_linear_params(
        k_params2, IN2, OUT2)
    x2 = jax.random.normal(k_x2, (B2, IN2), jnp.float32)
    ref2 = _reference(x2, w_real2, b_real2, w_imag2, b_imag2)

    # (a) fp32 path with small tiles -> grid (2, 2, 2): validates tiling exactly.
    params2_f32 = fuse_complex_linear_params(
        w_real2, b_real2, w_imag2, b_imag2,
        tn=256, tk=512, compute_dtype=jnp.float32)
    out2_f32 = jax.block_until_ready(
        complex_linear(x2, params2_f32, tm=128))
    assert out2_f32.shape == (B2, OUT2)
    assert jnp.allclose(out2_f32, ref2, atol=1e-4, rtol=1e-4)

    # (b) default bf16 path with default tiles (N axis auto-split for v7x).
    params2_bf16 = fuse_complex_linear_params(
        w_real2, b_real2, w_imag2, b_imag2)
    out2_r, out2_i = complex_linear(x2, params2_bf16, return_planes=True)
    out2_r = jax.block_until_ready(out2_r)
    out2_i = jax.block_until_ready(out2_i)
    assert out2_r.shape == (B2, OUT2) and out2_i.shape == (B2, OUT2)
    assert jnp.allclose(out2_r, ref2.real, atol=5e-2, rtol=5e-2)
    assert jnp.allclose(out2_i, ref2.imag, atol=5e-2, rtol=5e-2)

    print("KERNEL_OK")
</pallas_src>

<mosaic_0001>
module attributes {stable_mosaic.version = 11 : i64} {
  func.func @_fused_matmul_bias_kernel(%arg0: i32, %arg1: i32, %arg2: i32, %arg3: memref<8x128xf32, #tpu.memory_space<vmem>>, %arg4: memref<128x128xf32, #tpu.memory_space<vmem>>, %arg5: memref<1x128xf32, #tpu.memory_space<vmem>>, %arg6: memref<8x128xf32, #tpu.memory_space<vmem>>) attributes {dimension_semantics = [#tpu.dimension_semantics<parallel>, #tpu.dimension_semantics<parallel>, #tpu.dimension_semantics<arbitrary>], iteration_bounds = array<i64: 1, 1, 1>, scalar_prefetch = 0 : i64, scratch_operands = 0 : i64, tpu.core_type = #tpu.core_type<tc>, window_params = [{transform_indices = @transform_0, window_bounds = array<i64: 8, 128>}, {transform_indices = @transform_1, window_bounds = array<i64: 128, 128>}, {transform_indices = @transform_2, window_bounds = array<i64: 1, 128>}, {transform_indices = @transform_3, window_bounds = array<i64: 8, 128>}]} {
    %c0_i32 = arith.constant 0 : i32
    %0 = arith.cmpi eq, %arg2, %c0_i32 : i32
    %1 = arith.extui %0 : i1 to i32
    %c0_i32_0 = arith.constant 0 : i32
    %2 = arith.cmpi ne, %1, %c0_i32_0 : i32
    scf.if %2 {
      %c0_8 = arith.constant 0 : index
      %c0_9 = arith.constant 0 : index
      %9 = vector.load %arg5[%c0_8, %c0_9] : memref<1x128xf32, #tpu.memory_space<vmem>>, vector<1x128xf32>
      %10 = vector.shape_cast %9 : vector<1x128xf32> to vector<1x128xf32>
      %11 = vector.broadcast %10 : vector<1x128xf32> to vector<8x128xf32>
      %c0_10 = arith.constant 0 : index
      %c0_11 = arith.constant 0 : index
      %12 = vector.load %arg6[%c0_10, %c0_11] : memref<8x128xf32, #tpu.memory_space<vmem>>, vector<8x128xf32>
      tpu.vector_store %arg6[%c0_10, %c0_11], %11 {strides = array<i32>} : memref<8x128xf32, #tpu.memory_space<vmem>>, vector<8x128xf32>,
    } else {
    }
    %c0 = arith.constant 0 : index
    %c0_1 = arith.constant 0 : index
    %3 = vector.load %arg6[%c0, %c0_1] : memref<8x128xf32, #tpu.memory_space<vmem>>, vector<8x128xf32>
    %c0_2 = arith.constant 0 : index
    %c0_3 = arith.constant 0 : index
    %4 = vector.load %arg3[%c0_2, %c0_3] : memref<8x128xf32, #tpu.memory_space<vmem>>, vector<8x128xf32>
    %c0_4 = arith.constant 0 : index
    %c0_5 = arith.constant 0 : index
    %5 = vector.load %arg4[%c0_4, %c0_5] : memref<128x128xf32, #tpu.memory_space<vmem>>, vector<128x128xf32>
    %cst = arith.constant dense<0.000000e+00> : vector<8x128xf32>
    %6 = tpu.matmul %4, %5, %cst {dimension_numbers = #tpu.dot_dimension_numbers<[1], [0], [0], [1], [0, 0, 1, 1], [], []>} : vector<8x128xf32>, vector<128x128xf32>, vector<8x128xf32> -> vector<8x128xf32>
    %7 = arith.addf %3, %6 : vector<8x128xf32>
    %c0_6 = arith.constant 0 : index
    %c0_7 = arith.constant 0 : index
    %8 = vector.load %arg6[%c0_6, %c0_7] : memref<8x128xf32, #tpu.memory_space<vmem>>, vector<8x128xf32>
    tpu.vector_store %arg6[%c0_6, %c0_7], %7 {strides = array<i32>} : memref<8x128xf32, #tpu.memory_space<vmem>>, vector<8x128xf32>,
    return
  }
  func.func @transform_0(%arg0: i32, %arg1: i32, %arg2: i32) -> (i32, i32) {
    %c0_i32 = arith.constant 0 : i32
    return %arg0, %arg2 : i32, i32
  }
  func.func @transform_1(%arg0: i32, %arg1: i32, %arg2: i32) -> (i32, i32) {
    %c0_i32 = arith.constant 0 : i32
    return %arg2, %arg1 : i32, i32
  }
  func.func @transform_2(%arg0: i32, %arg1: i32, %arg2: i32) -> (i32, i32) {
    %c0_i32 = arith.constant 0 : i32
    %c0_i32_0 = arith.constant 0 : i32
    return %c0_i32, %arg1 : i32, i32
  }
  func.func @transform_3(%arg0: i32, %arg1: i32, %arg2: i32) -> (i32, i32) {
    %c0_i32 = arith.constant 0 : i32
    return %arg0, %arg1 : i32, i32
  }
}

</mosaic_0001>

<bundles_post_ra>
// kernel: tpu_custom_call.1
= control target key start
LH: loop header
LB: loop body
LE: loop exit
PB: predicated region body
PF: predicated region fallthrough
CT: control target
= control target key end

     0   :  { %8 = vsyncpa [#allocation3], 0  ;;  %s390_s0 = inlined_call_operand.hbm [shape: f32[8,128], index: 0, kind: input, shape index: {}]   ;;  %s391_s1 = inlined_call_operand.hbm [shape: f32[128,128], index: 1, kind: input, shape index: {}]   ;;  %s392_s2 = inlined_call_operand.vmem [shape: f32[1,128], index: 2, kind: input, shape index: {}]   ;;  %s393_s3 = inlined_call_operand.hbm [shape: f32[8,128], index: 3, kind: output, shape index: {}]  }
   0x1   :  { %9 = vsyncpa [#allocation6], 0 }
   0x2   :  { %10 = vsyncpa [#allocation4], 0  ;;  %s316_s12 = smov [#allocation2]   ;;  %s317_s14 = smov [#allocation5]  }
   0x3   :  { %s17_s13 = sshll.u32 %s316_s12, 4  ;;  %s26_s15 = sshll.u32 %s317_s14, 4  ;;  %s18_s13 = int_to_ptr.vmem [resolvable:$true] %s17_s13  ;;  %s344_s15 = int_to_ptr.vmem [resolvable:$true] %s26_s15 }
   0x4   :  { %s244_s18 = scalar_lea.hbm %s390_s0, 128 }
   0x5   :  { %p245_p0 = scmp.ne.s32.totalorder %s390_s0, %s244_s18  ;;  %p248_p1 = scmp.lt.u32.totalorder %s244_s18, %s390_s0 }
   0x7   :  { %p250_p2 = pnand %p248_p1, %p245_p0 }
   0x9   :  { %253 = shalt.err (!%p250_p2)
}
   0xa   :  { %s254_s23 = scalar_lea.vmem %s18_s13, 128  ;;  %p259_p4 = scmp.lt.s32.totalorder %s18_s13, %s18_s13 }
   0xb   :  { %p255_p3 = scmp.ne.s32.totalorder %s18_s13, %s254_s23  ;;  %p260_p5 = scmp.lt.s32.totalorder %s254_s23, %s254_s23 }
   0xd   :  { %p261_p6 = por %p260_p5, %p259_p4 }
   0xf   :  { %p262_p7 = pnand %p261_p6, %p255_p3 }
  0x11   :  { %265 = shalt.err (!%p262_p7)
}
  0x12   :  { %20 = dma.hbm_to_vmem [thread:$0]  %s390_s0, 128, %s18_s13, [#allocation3]  }
  0x13   :  { %s266_s28 = scalar_lea.hbm %s391_s1, 2048 }
  0x14   :  { %p267_p8 = scmp.ne.s32.totalorder %s391_s1, %s266_s28  ;;  %p270_p9 = scmp.lt.u32.totalorder %s266_s28, %s391_s1 }
  0x16   :  { %p272_p10 = pnand %p270_p9, %p267_p8 }
  0x18   :  { %275 = shalt.err (!%p272_p10)
}
  0x19   :  { %s276_s6 = scalar_lea.vmem %s344_s15, 2048  ;;  %p281_p12 = scmp.lt.s32.totalorder %s344_s15, %s344_s15 }
  0x1a   :  { %p277_p11 = scmp.ne.s32.totalorder %s344_s15, %s276_s6  ;;  %p282_p13 = scmp.lt.s32.totalorder %s276_s6, %s276_s6 }
  0x1c   :  { %p283_p0 = por %p282_p13, %p281_p12 }
  0x1e   :  { %p284_p1 = pnand %p283_p0, %p277_p11 }
  0x20   :  { %287 = shalt.err (!%p284_p1)
}
  0x21   :  { %s318_s0 = smov 128   ;;  %s319_s7 = smov 8  }
  0x22   :  { %32 = dma.hbm_to_vmem [thread:$0]  %s391_s1, 2048, %s344_s15, [#allocation6], %s318_s0, %s318_s0, %s319_s7  }
  0x23   :  { %310 = dma.done.wait [#allocation3], 128  }
  0x24   :  { %311 = vsyncadd [#allocation3], 4294967168 }
  0x25   :  { %312 = dma.done.wait [#allocation6], 2048  }
  0x26   :  { %313 = vsyncadd [#allocation6], 4294965248  ;;  %v320_v0 = vmov 0.0|0.0   ;;  %vm321_vm0 = vmmov 0   ;;  %v322_v1 = vmov 0.0   ;;  %v55_v2 = vld [vmem:[#allocation5] sm:$0xff] }
  0x27   :  { %212 = vmatprep.subr.bf16.mxu0 %v320_v0  ;;  %209 = vmatprep.mubr.msk.f32.mxu0 %vm321_vm0, %v322_v1  ;;  %v56_v3 = vld [vmem:[#allocation5 + $0x8] sm:$0xff]  ;;  %v57_v4 = vld [vmem:[#allocation5 + $0x10] sm:$0xff]  ;;  %v58_v6 = vld [vmem:[#allocation5 + $0x18] sm:$0xff]  ;;  %s323_s11 = smov [#allocation7]  }
  0x28   :  { %v213_v5 = vpack.c.bf16 %v56_v3, %v55_v2  ;;  %v216_v7 = vpack.c.bf16 %v58_v6, %v57_v4  ;;  %v59_v8 = vld [vmem:[#allocation5 + $0x20] sm:$0xff]  ;;  %v60_v9 = vld [vmem:[#allocation5 + $0x28] sm:$0xff]  ;;  %v61_v11 = vld [vmem:[#allocation5 + $0x30] sm:$0xff]  ;;  %s149_s12 = sshll.u32 %s323_s11, 4  ;;  %s150_s12 = int_to_ptr.vmem [resolvable:$true] %s149_s12 }
  0x29   :  { %v219_v10 = vpack.c.bf16 %v60_v9, %v59_v8  ;;  %v62_v12 = vld [vmem:[#allocation5 + $0x38] sm:$0xff]  ;;  %v63_v14 = vld [vmem:[#allocation5 + $0x40] sm:$0xff]  ;;  %v64_v15 = vld [vmem:[#allocation5 + $0x48] sm:$0xff]  ;;  %s288_s13 = scalar_lea.vmem %s150_s12, 128  ;;  %p293_p3 = scmp.lt.s32.totalorder %s150_s12, %s150_s12 }
  0x2a   :  { %214 = vmatpush3.bf16.msra.mxu0 %v213_v5  ;;  %v222_v13 = vpack.c.bf16 %v62_v12, %v61_v11  ;;  %v225_v16 = vpack.c.bf16 %v64_v15, %v63_v14  ;;  %v65_v17 = vld [vmem:[#allocation5 + $0x50] sm:$0xff]  ;;  %v66_v18 = vld [vmem:[#allocation5 + $0x58] sm:$0xff]  ;;  %v67_v20 = vld [vmem:[#allocation5 + $0x60] sm:$0xff]  ;;  %p289_p2 = scmp.ne.s32.totalorder %s150_s12, %s288_s13  ;;  %p294_p4 = scmp.lt.s32.totalorder %s288_s13, %s288_s13 }
  0x2b   :  { %215 = vmatprep.subr.bf16.mxu0 %v320_v0  ;;  %v228_v19 = vpack.c.bf16 %v66_v18, %v65_v17  ;;  %v68_v21 = vld [vmem:[#allocation5 + $0x68] sm:$0xff]  ;;  %v69_v23 = vld [vmem:[#allocation5 + $0x70] sm:$0xff]  ;;  %v70_v24 = vld [vmem:[#allocation5 + $0x78] sm:$0xff] }
  0x2c   :  { %v231_v22 = vpack.c.bf16 %v68_v21, %v67_v20  ;;  %v234_v25 = vpack.c.bf16 %v70_v24, %v69_v23  ;;  %v54_v26 = vld [vmem:[#allocation2] sm:$0xff]  ;;  %p295_p5 = por %p294_p4, %p293_p3 }
  0x2d   :  { %v159_v27 = vld [vmem:[%s392_s2] ss:$0 sm:$0xff] }
  0x2e   :  { %217 = vmatpush3.bf16.msra.mxu0 %v216_v7  ;;  %p296_p6 = pnand %p295_p5, %p289_p2 }
  0x2f   :  { %218 = vmatprep.subr.bf16.mxu0 %v320_v0 }
  0x32   :  { %220 = vmatpush3.bf16.msra.mxu0 %v219_v10 }
  0x33   :  { %221 = vmatprep.subr.bf16.mxu0 %v320_v0 }
  0x36   :  { %223 = vmatpush3.bf16.msra.mxu0 %v222_v13 }
  0x37   :  { %224 = vmatprep.subr.bf16.mxu0 %v320_v0 }
  0x3a   :  { %226 = vmatpush3.bf16.msra.mxu0 %v225_v16 }
  0x3b   :  { %227 = vmatprep.subr.bf16.mxu0 %v320_v0 }
  0x3e   :  { %229 = vmatpush3.bf16.msra.mxu0 %v228_v19 }
  0x3f   :  { %230 = vmatprep.subr.bf16.mxu0 %v320_v0 }
  0x42   :  { %232 = vmatpush3.bf16.msra.mxu0 %v231_v22 }
  0x43   :  { %233 = vmatprep.subr.bf16.mxu0 %v320_v0 }
  0x46   :  { %235 = vmatpush3.bf16.msra.mxu0 %v234_v25 }
  0x49   :  { %210 = vmatmul.mubr.f32.vlgmr.msra.gmra.mrb[0].mxu0 %v54_v26 }
 0x11c   :  { %v137_v28 = vpop.f32.mrb[0].mxu0 }
 0x11d   :  { %v141_v29 = vadd.f32 %v159_v27, %v137_v28  ;;  %v211_v30 = vpop.f32.mrb[1].mxu0 }
 0x11f   :  { %142 = vst [vmem:[#allocation7] sm:$0xff] %v141_v29 }
 0x120   :  { %299 = shalt.err (!%p296_p6)
}
 0x121   :  { %s300_s16 = scalar_lea.hbm %s393_s3, 128 }
 0x122   :  { %p301_p7 = scmp.ne.s32.totalorder %s393_s3, %s300_s16  ;;  %p304_p8 = scmp.lt.u32.totalorder %s300_s16, %s393_s3 }
 0x124   :  { %p306_p9 = pnand %p304_p8, %p301_p7 }
 0x126   :  { %309 = shalt.err (!%p306_p9)
}
 0x127   :  { %152 = dma.vmem_to_hbm [thread:$0]  %s150_s12, 128, %s393_s3, [#allocation4]  }
 0x128   :  { %314 = dma.done.wait [#allocation4], 128  }
 0x129   :  { %315 = vsyncadd [#allocation4], 4294967168 }
 0x12a   :  { %156 = vsyncpa [#allocation3], 1 }
 0x12b   :  { %157 = vsyncpa [#allocation6], 1 }
 0x12c   :  { %158 = vsyncpa [#allocation4], 1 }

</bundles_post_ra>
